<compile_context>
chip_gen: v5e
topology: v5e:2x2
jax: 0.10.0
libtpu: 0.0.40
codegen_flags: <defaults>
</compile_context>

<pallas_src>
import jax
import jax.numpy as jnp
from jax.experimental import pallas as pl
from jax.experimental.pallas import tpu as pltpu

EPS = 1e-6  # matches torch.nn.functional.pairwise_distance default eps


def _triplet_pulling_kernel(fac_ref, x_ref, o_ref):
    # x_ref: (3, TB, E) tile -> chunk 0 = anchor, 1 = positive, 2 = negative.
    a = x_ref[0]
    p = x_ref[1]
    n = x_ref[2]

    # pairwise_distance(x1, x2, p=2, eps=1e-6) == ||x1 - x2 + eps||_2 over last dim
    diff_pos = a - p + EPS
    diff_neg = a - n + EPS
    dist_pos = jnp.sqrt(jnp.sum(diff_pos * diff_pos, axis=-1, keepdims=True))
    dist_neg = jnp.sqrt(jnp.sum(diff_neg * diff_neg, axis=-1, keepdims=True))

    fac = fac_ref[0]                                    # exp(-alpha / jm), precomputed
    inv_dneg = pl.reciprocal(jnp.maximum(dist_neg, EPS))
    r = (dist_pos + (dist_neg - dist_pos) * fac) * inv_dneg   # (TB,1) bcast over E
    neg2 = a + (n - a) * r

    # One VPU select instead of two muls + sub; NaN in the unselected branch
    # cannot leak into the output.
    neg_hat = jnp.where(dist_pos >= dist_neg, n, neg2)

    # Only the negative chunk of the (aliased) output is written.
    o_ref[0] = neg_hat


def triplet_pulling(x, jm, *, embedding_size=128, alpha=90.0, tile_b=512):
    """x: (3*B, embedding_size) float32; jm: scalar (python float or jax scalar)."""
    total, e = x.shape
    assert e == embedding_size
    assert total % 3 == 0
    b = total // 3

    x3 = x.reshape(3, b, e)                       # free row-major view of the chunks
    fac = jnp.exp(-jnp.float32(alpha) / jnp.asarray(jm, jnp.float32)).reshape(1)

    # Pick a large batch tile; partial tail blocks are masked by Pallas.
    tb = min(int(tile_b), b)
    if tb != b:
        tb = max(8, (tb // 8) * 8)                # sublane dim multiple of 8
    grid = (pl.cdiv(b, tb),)

    out = pl.pallas_call(
        _triplet_pulling_kernel,
        out_shape=jax.ShapeDtypeStruct((3, b, e), x.dtype),
        grid=grid,
        in_specs=[
            pl.BlockSpec(memory_space=pltpu.MemorySpace.SMEM),     # fac scalar
            pl.BlockSpec((3, tb, e), lambda i: (0, i, 0)),          # x as (3, B, E)
        ],
        # Write only the negative chunk; anchor/positive come through the alias.
        out_specs=pl.BlockSpec((1, tb, e), lambda i: (2, i, 0)),
        input_output_aliases={1: 0},
        compiler_params=pltpu.CompilerParams(
            dimension_semantics=("parallel",)),
    )(fac, x3)

    return out.reshape(3 * b, e)


def _reference(x, jm, embedding_size=128, alpha=90.0):
    # Faithful JAX port of the PyTorch module's math.
    b = x.shape[0] // 3
    a, p, n = x[:b], x[b:2 * b], x[2 * b:]
    dpos = jnp.sqrt(jnp.sum((a - p + EPS) ** 2, axis=-1, keepdims=True))
    dneg = jnp.sqrt(jnp.sum((a - n + EPS) ** 2, axis=-1, keepdims=True))
    r = (dpos + (dneg - dpos) * jnp.exp(-alpha / jm)) / dneg
    neg2 = a + (n - a) * r
    mask = (dpos >= dneg).astype(x.dtype)
    neg_hat = n * mask + neg2 * (1.0 - mask)
    return jnp.concatenate([a, p, neg_hat], axis=0)


if __name__ == "__main__":
    EMBEDDING_SIZE = 128
    ALPHA = 90.0
    JM = 40.0
    key = jax.random.PRNGKey(0)
    k1, k2 = jax.random.split(key)

    # Case 1: small batch, single full block (tile == full chunk).
    B1 = 64
    x1 = jax.random.normal(k1, (3 * B1, EMBEDDING_SIZE), dtype=jnp.float32)
    out1 = jax.block_until_ready(triplet_pulling(x1, JM, alpha=ALPHA))
    ref1 = _reference(x1, JM, EMBEDDING_SIZE, ALPHA)
    assert out1.shape == (3 * B1, EMBEDDING_SIZE)
    assert jnp.allclose(out1, ref1, atol=1e-5, rtol=1e-5)

    # Case 2: multi-block grid with a ragged tail (160 = 2*64 + 32 rows/chunk).
    B2 = 160
    x2 = jax.random.normal(k2, (3 * B2, EMBEDDING_SIZE), dtype=jnp.float32)
    out2 = jax.block_until_ready(
        triplet_pulling(x2, JM, alpha=ALPHA, tile_b=64))
    ref2 = _reference(x2, JM, EMBEDDING_SIZE, ALPHA)
    assert out2.shape == (3 * B2, EMBEDDING_SIZE)
    assert jnp.allclose(out2, ref2, atol=1e-5, rtol=1e-5)

    print("KERNEL_OK")
</pallas_src>

<mosaic_0001>
module attributes {stable_mosaic.version = 11 : i64} {
  func.func @_triplet_pulling_kernel(%arg0: i32, %arg1: memref<1xf32, #tpu.memory_space<smem>>, %arg2: memref<3x64x128xf32, #tpu.memory_space<vmem>>, %arg3: memref<1x64x128xf32, #tpu.memory_space<vmem>>) attributes {dimension_semantics = [#tpu.dimension_semantics<parallel>], iteration_bounds = array<i64: 1>, scalar_prefetch = 0 : i64, scratch_operands = 0 : i64, tpu.core_type = #tpu.core_type<tc>, window_params = [{transform_indices = @transform_0, window_bounds = array<i64: 1>}, {transform_indices = @transform_1, window_bounds = array<i64: 3, 64, 128>}, {transform_indices = @transform_2, window_bounds = array<i64: 1, 64, 128>}]} {
    %c0 = arith.constant 0 : index
    %c0_0 = arith.constant 0 : index
    %c0_1 = arith.constant 0 : index
    %0 = vector.load %arg2[%c0, %c0_0, %c0_1] : memref<3x64x128xf32, #tpu.memory_space<vmem>>, vector<1x64x128xf32>
    %1 = vector.shape_cast %0 : vector<1x64x128xf32> to vector<64x128xf32>
    %c1 = arith.constant 1 : index
    %c0_2 = arith.constant 0 : index
    %c0_3 = arith.constant 0 : index
    %2 = vector.load %arg2[%c1, %c0_2, %c0_3] : memref<3x64x128xf32, #tpu.memory_space<vmem>>, vector<1x64x128xf32>
    %3 = vector.shape_cast %2 : vector<1x64x128xf32> to vector<64x128xf32>
    %c2 = arith.constant 2 : index
    %c0_4 = arith.constant 0 : index
    %c0_5 = arith.constant 0 : index
    %4 = vector.load %arg2[%c2, %c0_4, %c0_5] : memref<3x64x128xf32, #tpu.memory_space<vmem>>, vector<1x64x128xf32>
    %5 = vector.shape_cast %4 : vector<1x64x128xf32> to vector<64x128xf32>
    %6 = arith.subf %1, %3 : vector<64x128xf32>
    %cst = arith.constant 9.99999997E-7 : f32
    %7 = vector.broadcast %cst : f32 to vector<64x128xf32>
    %8 = arith.addf %6, %7 : vector<64x128xf32>
    %9 = arith.subf %1, %5 : vector<64x128xf32>
    %cst_6 = arith.constant 9.99999997E-7 : f32
    %10 = vector.broadcast %cst_6 : f32 to vector<64x128xf32>
    %11 = arith.addf %9, %10 : vector<64x128xf32>
    %12 = arith.mulf %8, %8 : vector<64x128xf32>
    %cst_7 = arith.constant dense<0.000000e+00> : vector<64xf32>
    %13 = vector.multi_reduction <add>, %12, %cst_7 [1] : vector<64x128xf32> to vector<64xf32>
    %14 = vector.shape_cast %13 : vector<64xf32> to vector<64x1xf32>
    %15 = math.sqrt %14 : vector<64x1xf32>
    %16 = arith.mulf %11, %11 : vector<64x128xf32>
    %cst_8 = arith.constant dense<0.000000e+00> : vector<64xf32>
    %17 = vector.multi_reduction <add>, %16, %cst_8 [1] : vector<64x128xf32> to vector<64xf32>
    %18 = vector.shape_cast %17 : vector<64xf32> to vector<64x1xf32>
    %19 = math.sqrt %18 : vector<64x1xf32>
    %c0_9 = arith.constant 0 : index
    %20 = memref.load %arg1[%c0_9] : memref<1xf32, #tpu.memory_space<smem>>
    %cst_10 = arith.constant 9.99999997E-7 : f32
    %21 = vector.broadcast %cst_10 : f32 to vector<64x1xf32>
    %22 = arith.maximumf %19, %21 : vector<64x1xf32>
    %23 = tpu.reciprocal %22 : vector<64x1xf32> -> vector<64x1xf32>
    %24 = arith.subf %19, %15 : vector<64x1xf32>
    %25 = vector.broadcast %20 : f32 to vector<64x1xf32>
    %26 = arith.mulf %24, %25 : vector<64x1xf32>
    %27 = arith.addf %15, %26 : vector<64x1xf32>
    %28 = arith.mulf %27, %23 : vector<64x1xf32>
    %29 = arith.subf %5, %1 : vector<64x128xf32>
    %30 = vector.broadcast %28 : vector<64x1xf32> to vector<64x128xf32>
    %31 = arith.mulf %29, %30 : vector<64x128xf32>
    %32 = arith.addf %1, %31 : vector<64x128xf32>
    %33 = arith.cmpf oge, %15, %19 : vector<64x1xf32>
    %34 = vector.shape_cast %33 : vector<64x1xi1> to vector<64x1xi1>
    %35 = vector.broadcast %34 : vector<64x1xi1> to vector<64x128xi1>
    %36 = arith.select %35, %5, %32 : vector<64x128xi1>, vector<64x128xf32>
    %c0_11 = arith.constant 0 : index
    %c0_12 = arith.constant 0 : index
    %c0_13 = arith.constant 0 : index
    %37 = vector.load %arg3[%c0_11, %c0_12, %c0_13] : memref<1x64x128xf32, #tpu.memory_space<vmem>>, vector<1x64x128xf32>
    %38 = vector.shape_cast %37 : vector<1x64x128xf32> to vector<64x128xf32>
    %39 = vector.shape_cast %36 : vector<64x128xf32> to vector<1x64x128xf32>
    tpu.vector_store %arg3[%c0_11, %c0_12, %c0_13], %39 {strides = array<i32>} : memref<1x64x128xf32, #tpu.memory_space<vmem>>, vector<1x64x128xf32>,
    return
  }
  func.func @transform_0(%arg0: i32) -> i32 {
    %c0_i32 = arith.constant 0 : i32
    %c0_i32_0 = arith.constant 0 : i32
    return %c0_i32 : i32
  }
  func.func @transform_1(%arg0: i32) -> (i32, i32, i32) {
    %c0_i32 = arith.constant 0 : i32
    %c0_i32_0 = arith.constant 0 : i32
    %c0_i32_1 = arith.constant 0 : i32
    return %c0_i32, %arg0, %c0_i32_0 : i32, i32, i32
  }
  func.func @transform_2(%arg0: i32) -> (i32, i32, i32) {
    %c2_i32 = arith.constant 2 : i32
    %c0_i32 = arith.constant 0 : i32
    %c0_i32_0 = arith.constant 0 : i32
    return %c2_i32, %arg0, %c0_i32 : i32, i32, i32
  }
}

</mosaic_0001>

<bundles_post_ra>
// kernel: tpu_custom_call.1
= control target key start
LH: loop header
LB: loop body
LE: loop exit
PB: predicated region body
PF: predicated region fallthrough
CT: control target
= control target key end

     0   :  { %8 = vsyncpa [#allocation4], 0  ;;  %s1201_s0 = inlined_call_operand.<no memory space> [shape: f32[1], index: 0, kind: input, shape index: {}]   ;;  %s1202_s1 = inlined_call_operand.hbm [shape: f32[3,64,128], index: 1, kind: input, shape index: {}, may-alias: {1,2}]   ;;  %s1203_s2 = inlined_call_operand.hbm [shape: f32[3,64,128], index: 2, kind: output, shape index: {}, may-alias: {1,2}]  }
   0x1   :  { %9 = vsyncpa [#allocation5], 0  ;;  %s16_s11 = sshll.u32 %s1202_s1, 4  ;;  %s669_s12 = smov [#allocation3]   ;;  %s17_s11 = int_to_ptr.hbm [resolvable:$true] %s16_s11 }
   0x2   :  { %s18_s13 = sshll.u32 %s669_s12, 4  ;;  %s670_s14 = smov 128   ;;  %s19_s13 = int_to_ptr.vmem [resolvable:$true] %s18_s13 }
   0x3   :  { %s671_s15 = smov 8  }
   0x4   :  { %24 = dma.hbm_to_vmem [thread:$0]  %s17_s11, 3072, %s19_s13, [#allocation4], %s670_s14, %s670_s14, %s671_s15  }
   0x5   :  { %665 = dma.done.wait [#allocation4], 3072  }
   0x6   :  { %666 = vsyncadd [#allocation4], 4294964224  ;;  %v694_v0 = vld [vmem:[#allocation3 + $0x20] sm:$0xff]  ;;  %v698_v2 = vld [vmem:[#allocation3 + $0x10] sm:$0xff]  ;;  %s549_s18 = scalar_lea.hbm %s1203_s2, 128  ;;  %s672_s19 = smov [#allocation6]  }
   0x7   :  { %v696_v1 = vld [vmem:[#allocation3 + $0xa0] sm:$0xff]  ;;  %v702_v4 = vld [vmem:[#allocation3 + $0x90] sm:$0xff]  ;;  %v712_v9 = vld [vmem:[#allocation3 + $0x28] sm:$0xff]  ;;  %s550_s20 = sshll.u32 %s672_s19, 4  ;;  %s552_s21 = sshll.u32 %s549_s18, 4  ;;  %s551_s20 = int_to_ptr.vmem [resolvable:$true] %s550_s20  ;;  %s553_s21 = int_to_ptr.hbm [resolvable:$true] %s552_s21 }
   0x8   :  { %v75_v3 = vsub.f32 %v694_v0, %v696_v1  ;;  %v704_v5 = vld [vmem:[#allocation3] sm:$0xff]  ;;  %v73_v7 = vsub.f32 %v698_v2, %v702_v4  ;;  %v714_v10 = vld [vmem:[#allocation3 + $0xa8] sm:$0xff]  ;;  %v716_v11 = vld [vmem:[#allocation3 + $0x18] sm:$0xff] }
   0x9   :  { %v706_v6 = vld [vmem:[#allocation3 + $0x80] sm:$0xff]  ;;  %v76_v13 = vsub.f32 %v712_v9, %v714_v10  ;;  %v720_v14 = vld [vmem:[#allocation3 + $0x98] sm:$0xff]  ;;  %v722_v15 = vld [vmem:[#allocation3 + $0x8] sm:$0xff] }
   0xa   :  { %v71_v8 = vsub.f32 %v704_v5, %v706_v6  ;;  %v83_v12 = vadd.f32 1e-06, %v75_v3  ;;  %v724_v16 = vld [vmem:[#allocation3 + $0x88] sm:$0xff]  ;;  %v81_v17 = vadd.f32 1e-06, %v73_v7  ;;  %v74_v19 = vsub.f32 %v716_v11, %v720_v14  ;;  %v730_v27 = vld [vmem:[#allocation3 + $0x38] sm:$0xff] }
   0xb   :  { %v72_v21 = vsub.f32 %v722_v15, %v724_v16  ;;  %v84_v24 = vadd.f32 1e-06, %v76_v13  ;;  %v38_v28 = vld [vmem:[#allocation3 + $0x40] sm:$0xff]  ;;  %v732_v29 = vld [vmem:[#allocation3 + $0xb8] sm:$0xff]  ;;  %v734_v30 = vld [vmem:[#allocation3 + $0x30] sm:$0xff] }
   0xc   :  { %v79_v18 = vadd.f32 1e-06, %v71_v8  ;;  %v211_v20 = vmul.f32 %v83_v12, %v83_v12  ;;  %v209_v22 = vmul.f32 %v81_v17, %v81_v17  ;;  %v82_v25 = vadd.f32 1e-06, %v74_v19  ;;  %v736_v31 = vld [vmem:[#allocation3 + $0xb0] sm:$0xff]  ;;  %v41_v41 = vld [vmem:[#allocation3 + $0x58] sm:$0xff] }
   0xd   :  { %v80_v26 = vadd.f32 1e-06, %v72_v21  ;;  %v212_v32 = vmul.f32 %v84_v24, %v84_v24  ;;  %v55_v33 = vsub.f32 %v704_v5, %v38_v28  ;;  %v78_v36 = vsub.f32 %v730_v27, %v732_v29  ;;  %v40_v42 = vld [vmem:[#allocation3 + $0x50] sm:$0xff]  ;;  %v39_v43 = vld [vmem:[#allocation3 + $0x48] sm:$0xff]  ;;  %v42_v55 = vld [vmem:[#allocation3 + $0x60] sm:$0xff] }
   0xe   :  { %v207_v23 = vmul.f32 %v79_v18, %v79_v18  ;;  %223 = vadd.xlane.f32.xlu2 %v211_v20  ;;  %219 = vadd.xlane.f32.xlu1 %v209_v22  ;;  %v210_v34 = vmul.f32 %v82_v25, %v82_v25  ;;  %v77_v37 = vsub.f32 %v734_v30, %v736_v31  ;;  %v44_v53 = vld [vmem:[#allocation3 + $0x70] sm:$0xff]  ;;  %v43_v54 = vld [vmem:[#allocation3 + $0x68] sm:$0xff]  ;;  %v45_v7 = vld [vmem:[#allocation3 + $0x78] sm:$0xff] }
   0xf   :  { %v208_v35 = vmul.f32 %v80_v26, %v80_v26  ;;  %v63_v38 = vadd.f32 1e-06, %v55_v33  ;;  %v86_v39 = vadd.f32 1e-06, %v78_v36  ;;  %v58_v45 = vsub.f32 %v716_v11, %v41_v41 }
  0x10   :  { %215 = vadd.xlane.f32.xlu0 %v207_v23  ;;  %v85_v40 = vadd.f32 1e-06, %v77_v37  ;;  %v57_v48 = vsub.f32 %v698_v2, %v40_v42  ;;  %v56_v49 = vsub.f32 %v722_v15, %v39_v43  ;;  %v61_v57 = vsub.f32 %v734_v30, %v44_v53 }
  0x11   :  { %v87_v44 = vmul.f32 %v63_v38, %v63_v38  ;;  %v214_v46 = vmul.f32 %v86_v39, %v86_v39  ;;  %v66_v50 = vadd.f32 1e-06, %v58_v45  ;;  %v60_v60 = vsub.f32 %v712_v9, %v43_v54 }
  0x12   :  { %v213_v47 = vmul.f32 %v85_v40, %v85_v40  ;;  %v65_v51 = vadd.f32 1e-06, %v57_v48  ;;  %v64_v52 = vadd.f32 1e-06, %v56_v49  ;;  %v59_v61 = vsub.f32 %v694_v0, %v42_v55 }
  0x13   :  { %v90_v56 = vmul.f32 %v66_v50, %v66_v50  ;;  %v69_v62 = vadd.f32 1e-06, %v61_v57  ;;  %v68_v63 = vadd.f32 1e-06, %v60_v60  ;;  %v62_v17 = vsub.f32 %v730_v27, %v45_v7 }
  0x14   :  { %v89_v58 = vmul.f32 %v65_v51, %v65_v51  ;;  %v88_v59 = vmul.f32 %v64_v52, %v64_v52  ;;  %v67_v3 = vadd.f32 1e-06, %v59_v61 }
  0x15   :  { %v93_v8 = vmul.f32 %v69_v62, %v69_v62  ;;  %v92_v12 = vmul.f32 %v68_v63, %v68_v63  ;;  %v70_v18 = vadd.f32 1e-06, %v62_v17 }
  0x16   :  { %225 = vadd.xlane.f32.xlu2 %v212_v32  ;;  %221 = vadd.xlane.f32.xlu1 %v210_v34  ;;  %v91_v13 = vmul.f32 %v67_v3, %v67_v3 }
  0x17   :  { %v94_v19 = vmul.f32 %v70_v18, %v70_v18 }
  0x18   :  { %217 = vadd.xlane.f32.xlu0 %v208_v35 }
  0x1e   :  { %95 = vadd.xlane.f32.xlu2 %v87_v44  ;;  %229 = vadd.xlane.f32.xlu1 %v214_v46 }
  0x20   :  { %227 = vadd.xlane.f32.xlu0 %v213_v47 }
  0x26   :  { %101 = vadd.xlane.f32.xlu2 %v90_v56  ;;  %99 = vadd.xlane.f32.xlu1 %v89_v58 }
  0x28   :  { %97 = vadd.xlane.f32.xlu0 %v88_v59 }
  0x2e   :  { %107 = vadd.xlane.f32.xlu2 %v93_v8  ;;  %105 = vadd.xlane.f32.xlu1 %v92_v12 }
  0x30   :  { %103 = vadd.xlane.f32.xlu0 %v91_v13 }
  0x38   :  { %109 = vadd.xlane.f32.xlu0 %v94_v19 }
  0x81   :  { %v750_v20 = vpop.xlane.xlu2 %223  ;;  %v220_v21 = vpop.xlane.xlu1 %219 }
  0x82   :  { %569 = vrsqrt.f32 %v750_v20  ;;  %vm286_vm0 = vcmp.eq.f32.partialorder %v750_v20, inf  ;;  %vm262_vm1 = vcmp.eq.f32.partialorder %v220_v21, inf  ;;  %vm264_vm2 = vcmp.eq.f32.partialorder %v220_v21, 0.0 }
  0x83   :  { %v216_v22 = vpop.xlane.xlu0 %215  ;;  %571 = vrsqrt.f32 %v220_v21  ;;  %v265_v56 = vand.u32 2147483648, %v220_v21  ;;  %vm288_vm5 = vcmp.eq.f32.partialorder %v750_v20, 0.0 }
  0x84   :  { %573 = vrsqrt.f32 %v216_v22  ;;  %vm238_vm3 = vcmp.eq.f32.partialorder %v216_v22, inf  ;;  %v241_v63 = vand.u32 2147483648, %v216_v22  ;;  %vm240_vm4 = vcmp.eq.f32.partialorder %v216_v22, 0.0 }
  0x88   :  { %v570_v23 = vpop.eup %569 }
  0x89   :  { %v572_v24 = vpop.eup %571  ;;  %v280_v25 = vmul.f32 %v570_v23, %v750_v20  ;;  %v754_v26 = vpop.xlane.xlu2 %225 }
  0x8a   :  { %v574_v28 = vpop.eup %573  ;;  %v256_v32 = vmul.f32 %v572_v24, %v220_v21  ;;  %575 = vrsqrt.f32 %v754_v26  ;;  %v757_v33 = vpop.xlane.xlu1 %221  ;;  %vm298_vm10 = vcmp.eq.f32.partialorder %v754_v26, inf  ;;  %vm300_vm11 = vcmp.eq.f32.partialorder %v754_v26, 0.0 }
  0x8b   :  { %v759_v34 = vpop.xlane.xlu0 %217  ;;  %v281_v35 = vmul.f32 %v570_v23, %v280_v25  ;;  %v232_v36 = vmul.f32 %v574_v28, %v216_v22  ;;  %577 = vrsqrt.f32 %v757_v33  ;;  %vm274_vm6 = vcmp.eq.f32.partialorder %v757_v33, inf }
  0x8c   :  { %v257_v37 = vmul.f32 %v572_v24, %v256_v32  ;;  %579 = vrsqrt.f32 %v759_v34  ;;  %vm250_vm7 = vcmp.eq.f32.partialorder %v759_v34, inf  ;;  %vm252_vm8 = vcmp.eq.f32.partialorder %v759_v34, 0.0 }
  0x8d   :  { %v282_v38 = vmul.f32 0.5, %v281_v35  ;;  %v233_v39 = vmul.f32 %v574_v28, %v232_v36  ;;  %vm276_vm9 = vcmp.eq.f32.partialorder %v757_v33, 0.0 }
  0x8e   :  { %v258_v40 = vmul.f32 0.5, %v257_v37  ;;  %v289_v37 = vand.u32 2147483648, %v750_v20 }
  0x8f   :  { %v283_v41 = vsub.f32 1.5, %v282_v38  ;;  %v234_v42 = vmul.f32 0.5, %v233_v39 }
  0x90   :  { %v576_v43 = vpop.eup %575  ;;  %v259_v44 = vsub.f32 1.5, %v258_v40 }
  0x91   :  { %v578_v45 = vpop.eup %577  ;;  %v284_v46 = vmul.f32 %v570_v23, %v283_v41  ;;  %v235_v47 = vsub.f32 1.5, %v234_v42  ;;  %v292_v48 = vmul.f32 %v576_v43, %v754_v26  ;;  %v772_v8 = vpop.xlane.xlu2 %95 }
  0x92   :  { %v260_v49 = vmul.f32 %v572_v24, %v259_v44  ;;  %v268_v50 = vmul.f32 %v578_v45, %v757_v33  ;;  %v766_v51 = vpop.xlane.xlu1 %229  ;;  %v580_v52 = vpop.eup %579  ;;  %v277_v44 = vand.u32 2147483648, %v757_v33  ;;  %vm118_vm12 = vcmp.eq.f32.partialorder %v772_v8, inf }
  0x93   :  { %v236_v53 = vmul.f32 %v574_v28, %v235_v47  ;;  %v293_v54 = vmul.f32 %v576_v43, %v292_v48  ;;  %581 = vrsqrt.f32 %v766_v51  ;;  %v244_v58 = vmul.f32 %v580_v52, %v759_v34 }
  0x94   :  { %v261_v55 = vmul.f32 %v260_v49, %v220_v21  ;;  %v269_v57 = vmul.f32 %v578_v45, %v268_v50  ;;  %v285_v59 = vmul.f32 %v284_v46, %v750_v20  ;;  %583 = vrsqrt.f32 %v772_v8 }
  0x95   :  { %v237_v60 = vmul.f32 %v236_v53, %v216_v22  ;;  %v294_v61 = vmul.f32 0.5, %v293_v54  ;;  %v245_v7 = vmul.f32 %v580_v52, %v244_v58  ;;  %vm322_vm13 = vcmp.eq.f32.partialorder %v766_v51, inf }
  0x96   :  { %v263_v62 = vsel %vm262_vm1, %v220_v21, %v261_v55  ;;  %v270_v3 = vmul.f32 0.5, %v269_v57  ;;  %v287_v28 = vsel %vm286_vm0, %v750_v20, %v285_v59  ;;  %v788_v21 = vpop.xlane.xlu0 %227  ;;  %vm324_vm14 = vcmp.eq.f32.partialorder %v766_v51, 0.0 }
  0x97   :  { %v775_v12 = vsel %vm264_vm2, %v265_v56, %v263_v62  ;;  %v239_v13 = vsel %vm238_vm3, %v216_v22, %v237_v60  ;;  %v295_v17 = vsub.f32 1.5, %v294_v61  ;;  %v246_v24 = vmul.f32 0.5, %v245_v7 }
  0x98   :  { %v778_v18 = vmax.f32 %v775_v12, 1e-06  ;;  %v780_v19 = vsel %vm240_vm4, %v241_v63, %v239_v13  ;;  %v271_v23 = vsub.f32 1.5, %v270_v3  ;;  %v798_v42 = vsel %vm288_vm5, %v289_v37, %v287_v28 }
  0x99   :  { %v582_v25 = vpop.eup %581  ;;  %v786_v32 = vmax.f32 %v780_v19, 1e-06  ;;  %v247_v35 = vsub.f32 1.5, %v246_v24  ;;  %v296_v38 = vmul.f32 %v576_v43, %v295_v17  ;;  %v253_v43 = vand.u32 2147483648, %v759_v34 }
  0x9a   :  { %585 = vrcp.f32 %v778_v18  ;;  %v272_v22 = vmul.f32 %v578_v45, %v271_v23  ;;  %v316_v36 = vmul.f32 %v582_v25, %v766_v51  ;;  %v584_v46 = vpop.eup %583  ;;  %v809_v49 = vmax.f32 %v798_v42, 1e-06 }
  0x9b   :  { %587 = vrcp.f32 %v786_v32  ;;  %v248_v40 = vmul.f32 %v580_v52, %v247_v35  ;;  %v297_v50 = vmul.f32 %v296_v38, %v754_v26  ;;  %v112_v60 = vmul.f32 %v584_v46, %v772_v8 }
  0x9c   :  { %v273_v39 = vmul.f32 %v272_v22, %v757_v33  ;;  %v317_v41 = vmul.f32 %v582_v25, %v316_v36  ;;  %589 = vrsqrt.f32 %v788_v21  ;;  %v301_v62 = vand.u32 2147483648, %v754_v26 }
  0x9d   :  { %v249_v45 = vmul.f32 %v248_v40, %v759_v34  ;;  %591 = vrcp.f32 %v809_v49  ;;  %v113_v13 = vmul.f32 %v584_v46, %v112_v60  ;;  %v481_v28 = vsub.f32 %v706_v6, %v704_v5 }
  0x9e   :  { %v275_v20 = vsel %vm274_vm6, %v757_v33, %v273_v39  ;;  %v318_v47 = vmul.f32 0.5, %v317_v41  ;;  %v299_v33 = vsel %vm298_vm10, %v754_v26, %v297_v50  ;;  %v851_v26 = vpop.xlane.xlu1 %99  ;;  %v345_v41 = vand.u32 2147483647, %v786_v32 }
  0x9f   :  { %v251_v52 = vsel %vm250_vm7, %v759_v34, %v249_v45  ;;  %v819_v56 = vsel %vm276_vm9, %v277_v44, %v275_v20  ;;  %v840_v17 = vsel %vm300_vm11, %v301_v62, %v299_v33  ;;  %v114_v36 = vmul.f32 0.5, %v113_v13  ;;  %v876_v33 = vpop.xlane.xlu0 %97 }
  0xa0   :  { %v806_v48 = vpop.eup %585  ;;  %v817_v54 = vsel %vm252_vm8, %v253_v43, %v251_v52  ;;  %v319_v58 = vsub.f32 1.5, %v318_v47  ;;  %v835_v63 = vmax.f32 %v819_v56, 1e-06  ;;  %v856_v39 = vmax.f32 %v840_v17, 1e-06 }
  0xa1   :  { %v814_v53 = vpop.eup %587  ;;  %v823_v57 = vmax.f32 %v817_v54, 1e-06  ;;  %v365_v61 = vmul.f32 %v806_v48, %v778_v18  ;;  %v115_v44 = vsub.f32 1.5, %v114_v36  ;;  %v325_v20 = vand.u32 2147483648, %v766_v51 }
  0xa2   :  { %v590_v55 = vpop.eup %589  ;;  %v337_v34 = vmul.f32 %v814_v53, %v786_v32  ;;  %v320_v23 = vmul.f32 %v582_v25, %v319_v58  ;;  %v313_v43 = vand.u32 2147483648, %v788_v21  ;;  %vm310_vm15 = vcmp.eq.f32.partialorder %v788_v21, inf }
  0xa3   :  { %v304_v59 = vmul.f32 %v590_v55, %v788_v21  ;;  %593 = vrcp.f32 %v823_v57  ;;  %v366_v38 = vsub.f32 1.0, %v365_v61  ;;  %v853_v25 = vpop.eup %591  ;;  %v116_v50 = vmul.f32 %v584_v46, %v115_v44 }
  0xa4   :  { %v338_v35 = vsub.f32 1.0, %v337_v34  ;;  %595 = vrcp.f32 %v835_v63  ;;  %v321_v45 = vmul.f32 %v320_v23, %v766_v51  ;;  %v870_v58 = vmul.f32 %v853_v25, %v809_v49 }
  0xa5   :  { %v305_v3 = vmul.f32 %v590_v55, %v304_v59  ;;  %597 = vrsqrt.f32 %v851_v26  ;;  %vm341_vm0 = vweird.f32 %v786_v32  ;;  %v347_v59 = vand.u32 2147483648, %v786_v32 }
  0xa6   :  { %v339_v47 = vmul.f32 %v814_v53, %v338_v35  ;;  %v367_v34 = vmul.f32 %v806_v48, %v366_v38  ;;  %599 = vrcp.f32 %v856_v39  ;;  %vm342_vm1 = vweird.f32 %v814_v53 }
  0xa7   :  { %v306_v24 = vmul.f32 0.5, %v305_v3  ;;  %vm880_vm2 = vcmp.eq.f32.partialorder %v345_v41, 8.507059e+37  ;;  %v117_v61 = vmul.f32 %v116_v50, %v772_v8  ;;  %v323_v3 = vsel %vm322_vm13, %v766_v51, %v321_v45  ;;  %vm920_vm6 = vmor %vm341_vm0, %vm342_vm1 }
  0xa8   :  { %v893_v13 = vstv %s1201_s0  ;;  %vm120_vm3 = vcmp.eq.f32.partialorder %v772_v8, 0.0  ;;  %vm312_vm4 = vcmp.eq.f32.partialorder %v788_v21, 0.0  ;;  %601 = vrsqrt.f32 %v876_v33 }
  0xa9   :  { %v307_v40 = vsub.f32 1.5, %v306_v24  ;;  %v866_v52 = vpop.eup %593  ;;  %v340_v24 = vadd.f32 %v814_v53, %v339_v47  ;;  %v119_v35 = vsel %vm118_vm12, %v772_v8, %v117_v61  ;;  %v368_v38 = vadd.f32 %v806_v48, %v367_v34 }
  0xaa   :  { %v885_v62 = vpop.eup %595  ;;  %v351_v23 = vmul.f32 %v866_v52, %v823_v57  ;;  %vm370_vm5 = vweird.f32 %v806_v48  ;;  %v912_v45 = vsel %vm324_vm14, %v325_v20, %v323_v3  ;;  %v348_v34 = vor.u32 1.1754944e-38, %v347_v59  ;;  %v927_v20 = vpop.xlane.xlu2 %101 }
  0xab   :  { %v308_v46 = vmul.f32 %v590_v55, %v307_v40  ;;  %v121_v55 = vand.u32 2147483648, %v772_v8  ;;  %v373_v40 = vand.u32 2147483647, %v778_v18  ;;  %v598_v41 = vpop.eup %597  ;;  %v379_v44 = vmul.f32 %v885_v62, %v835_v63 }
  0xac   :  { %vm369_vm7 = vweird.f32 %v778_v18  ;;  %v375_v61 = vand.u32 2147483648, %v778_v18  ;;  %v136_v51 = vmul.f32 %v598_v41, %v851_v26  ;;  %v344_v32 = vsel %vm920_vm6, %v814_v53, %v340_v24 }
  0xad   :  { %v122_v36 = vsel %vm120_vm3, %v121_v55, %v119_v35  ;;  %v309_v47 = vmul.f32 %v308_v46, %v788_v21  ;;  %v929_v46 = vpop.eup %599  ;;  %v352_v55 = vsub.f32 1.0, %v351_v23  ;;  %vm938_vm8 = vmor %vm369_vm7, %vm370_vm5  ;;  %v943_v18 = vmax.f32 %v912_v45, 1e-06 }
  0xae   :  { %v448_v8 = vsub.f32 %v780_v19, %v122_v36  ;;  %v372_v22 = vsel %vm938_vm8, %v806_v48, %v368_v38  ;;  %vm948_vm9 = vcmp.eq.f32.partialorder %v373_v40, 8.507059e+37  ;;  %v137_v53 = vmul.f32 %v598_v41, %v136_v51  ;;  %v602_v24 = vpop.eup %601 }
  0xaf   :  { %v311_v50 = vsel %vm310_vm15, %v788_v21, %v309_v47  ;;  %603 = vrsqrt.f32 %v927_v20  ;;  %v349_v37 = vsel %vm880_vm2, %v348_v34, %v344_v32  ;;  %v376_v7 = vor.u32 1.1754944e-38, %v375_v61  ;;  %v972_v61 = vpop.xlane.xlu1 %105 }
  0xb0   :  { %v457_v35 = vmul.f32 %v893_v13, %v448_v8  ;;  %v380_v8 = vsub.f32 1.0, %v379_v44  ;;  %v138_v59 = vmul.f32 0.5, %v137_v53  ;;  %v124_v48 = vmul.f32 %v602_v24, %v876_v33 }
  0xb1   :  { %vm142_vm10 = vcmp.eq.f32.partialorder %v851_v26, inf  ;;  %vm144_vm11 = vcmp.eq.f32.partialorder %v851_v26, 0.0  ;;  %v353_v40 = vmul.f32 %v866_v52, %v352_v55  ;;  %v966_v44 = vsel %vm312_vm4, %v313_v43, %v311_v50 }
  0xb2   :  { %v465_v3 = vadd.f32 %v457_v35, %v122_v36  ;;  %v970_v60 = vsel %vm948_vm9, %v376_v7, %v372_v22  ;;  %v139_v47 = vsub.f32 1.5, %v138_v59  ;;  %v125_v34 = vmul.f32 %v602_v24, %v124_v48 }
  0xb3   :  { %v145_v51 = vand.u32 2147483648, %v851_v26  ;;  %v361_v21 = vand.u32 2147483648, %v823_v57  ;;  %vm355_vm12 = vweird.f32 %v823_v57  ;;  %vm356_vm13 = vweird.f32 %v866_v52 }
  0xb4   :  { %v473_v38 = vmul.f32 %v465_v3, %v349_v37  ;;  %v359_v3 = vand.u32 2147483647, %v823_v57  ;;  %v140_v43 = vmul.f32 %v598_v41, %v139_v47  ;;  %v126_v7 = vmul.f32 0.5, %v125_v34  ;;  %vm1004_vm0 = vmor %vm355_vm12, %vm356_vm13 }
  0xb5   :  { %v604_v22 = vpop.eup %603  ;;  %v983_v55 = vmax.f32 %v966_v44, 1e-06  ;;  %605 = vrsqrt.f32 %v972_v61  ;;  %vm505_vm14 = vcmp.ge.f32.partialorder %v122_v36, %v780_v19  ;;  %v362_v59 = vor.u32 1.1754944e-38, %v361_v21 }
  0xb6   :  { %v489_v37 = vmul.f32 %v481_v28, %v473_v38  ;;  %v354_v28 = vadd.f32 %v866_v52, %v353_v40  ;;  %v141_v35 = vmul.f32 %v140_v43, %v851_v26  ;;  %v127_v41 = vsub.f32 1.5, %v126_v7  ;;  %v1029_v7 = vpop.xlane.xlu0 %103 }
  0xb7   :  { %v148_v23 = vmul.f32 %v604_v22, %v927_v20  ;;  %vm992_vm15 = vcmp.eq.f32.partialorder %v359_v3, 8.507059e+37  ;;  %vm130_vm1 = vcmp.eq.f32.partialorder %v876_v33, inf  ;;  %607 = vrcp.f32 %v983_v55 }
  0xb8   :  { %v497_v32 = vadd.f32 %v489_v37, %v704_v5  ;;  %v381_v5 = vmul.f32 %v885_v62, %v380_v8  ;;  %v143_v48 = vsel %vm142_vm10, %v851_v26, %v141_v35  ;;  %v358_v38 = vsel %vm1004_vm0, %v866_v52, %v354_v28 }
  0xb9   :  { %v149_v36 = vmul.f32 %v604_v22, %v148_v23  ;;  %v146_v8 = vsel %vm144_vm11, %v145_v51, %v143_v48  ;;  %vm132_vm2 = vcmp.eq.f32.partialorder %v876_v33, 0.0  ;;  %v133_v37 = vand.u32 2147483648, %v876_v33 }
  0xba   :  { %v529_v53 = vsel %vm505_vm14, %v706_v6, %v497_v32  ;;  %v128_v6 = vmul.f32 %v602_v24, %v127_v41  ;;  %v450_v57 = vsub.f32 %v775_v12, %v146_v8  ;;  %v387_v24 = vand.u32 2147483647, %v835_v63 }
  0xbb   :  { %537 = vst [vmem:[#allocation6] sm:$0xff] %v529_v53  ;;  %v150_v47 = vmul.f32 0.5, %v149_v36  ;;  %v606_v34 = vpop.eup %605  ;;  %v382_v3 = vadd.f32 %v885_v62, %v381_v5  ;;  %vm384_vm3 = vweird.f32 %v885_v62  ;;  %v407_v26 = vmul.f32 %v929_v46, %v856_v39 }
  0xbc   :  { %v129_v40 = vmul.f32 %v128_v6, %v876_v33  ;;  %v459_v52 = vmul.f32 %v893_v13, %v450_v57  ;;  %v389_v21 = vand.u32 2147483648, %v835_v63  ;;  %v363_v32 = vsel %vm992_vm15, %v362_v59, %v358_v38 }
  0xbd   :  { %v151_v43 = vsub.f32 1.5, %v150_v47  ;;  %vm383_vm4 = vweird.f32 %v835_v63  ;;  %v172_v35 = vmul.f32 %v606_v34, %v972_v61  ;;  %vm1042_vm6 = vcmp.eq.f32.partialorder %v387_v24, 8.507059e+37  ;;  %v1046_v59 = vpop.eup %607 }
  0xbe   :  { %v131_v51 = vsel %vm130_vm1, %v876_v33, %v129_v40  ;;  %v467_v41 = vadd.f32 %v459_v52, %v146_v8  ;;  %vm1038_vm5 = vmor %vm383_vm4, %vm384_vm3  ;;  %v408_v33 = vsub.f32 1.0, %v407_v26  ;;  %609 = vrsqrt.f32 %v1029_v7 }
  0xbf   :  { %v134_v28 = vsel %vm132_vm2, %v133_v37, %v131_v51  ;;  %v152_v50 = vmul.f32 %v604_v22, %v151_v43  ;;  %v386_v63 = vsel %vm1038_vm5, %v885_v62, %v382_v3  ;;  %v173_v48 = vmul.f32 %v606_v34, %v172_v35 }
  0xc0   :  { %v449_v23 = vsub.f32 %v817_v54, %v134_v28  ;;  %v475_v19 = vmul.f32 %v467_v41, %v970_v60  ;;  %v390_v36 = vor.u32 1.1754944e-38, %v389_v21  ;;  %vm154_vm7 = vcmp.eq.f32.partialorder %v927_v20, inf }
  0xc1   :  { %v153_v38 = vmul.f32 %v152_v50, %v927_v20  ;;  %vm156_vm8 = vcmp.eq.f32.partialorder %v927_v20, 0.0  ;;  %v157_v22 = vand.u32 2147483648, %v927_v20  ;;  %v174_v57 = vmul.f32 0.5, %v173_v48 }
  0xc2   :  { %v458_v6 = vmul.f32 %v893_v13, %v449_v23  ;;  %v1220_v62 = vsub.f32 %v702_v4, %v698_v2  ;;  %v391_v60 = vsel %vm1042_vm6, %v390_v36, %v386_v63  ;;  %v409_v3 = vmul.f32 %v929_v46, %v408_v33  ;;  %v1072_v23 = vpop.xlane.xlu2 %107 }
  0xc3   :  { %v155_v47 = vsel %vm154_vm7, %v927_v20, %v153_v38  ;;  %vm411_vm9 = vweird.f32 %v856_v39  ;;  %v175_v26 = vsub.f32 1.5, %v174_v57  ;;  %vm412_vm10 = vweird.f32 %v929_v46 }
  0xc4   :  { %v491_v40 = vmul.f32 %v1220_v62, %v475_v19  ;;  %v466_v24 = vadd.f32 %v458_v6, %v134_v28  ;;  %v158_v37 = vsel %vm156_vm8, %v157_v22, %v155_v47  ;;  %v610_v43 = vpop.eup %609  ;;  %vm507_vm11 = vcmp.ge.f32.partialorder %v146_v8, %v775_v12  ;;  %vm1097_vm15 = vmor %vm411_vm9, %vm412_vm10 }
  0xc5   :  { %v451_v21 = vsub.f32 %v819_v56, %v158_v37  ;;  %v415_v35 = vand.u32 2147483647, %v856_v39  ;;  %v417_v20 = vand.u32 2147483648, %v856_v39  ;;  %v176_v41 = vmul.f32 %v606_v34, %v175_v26 }
  0xc6   :  { %v499_v52 = vadd.f32 %v491_v40, %v698_v2  ;;  %v474_v51 = vmul.f32 %v466_v24, %v363_v32  ;;  %v1221_v2 = vsub.f32 %v724_v16, %v722_v15  ;;  %v160_v50 = vmul.f32 %v610_v43, %v1029_v7  ;;  %v1111_v40 = vpop.xlane.xlu0 %109 }
  0xc7   :  { %v460_v5 = vmul.f32 %v893_v13, %v451_v21  ;;  %v410_v12 = vadd.f32 %v929_v46, %v409_v3  ;;  %v177_v8 = vmul.f32 %v176_v41, %v972_v61  ;;  %vm178_vm12 = vcmp.eq.f32.partialorder %v972_v61, inf }
  0xc8   :  { %v531_v53 = vsel %vm507_vm11, %v702_v4, %v499_v52  ;;  %v490_v32 = vmul.f32 %v1221_v2, %v474_v51  ;;  %v181_v34 = vand.u32 2147483648, %v972_v61  ;;  %v161_v33 = vmul.f32 %v610_v43, %v160_v50 }
  0xc9   :  { %539 = vst [vmem:[#allocation6 + $0x10] sm:$0xff] %v531_v53  ;;  %v468_v4 = vadd.f32 %v460_v5, %v158_v37  ;;  %611 = vrsqrt.f32 %v1072_v23  ;;  %vm506_vm13 = vcmp.ge.f32.partialorder %v134_v28, %v817_v54  ;;  %v179_v48 = vsel %vm178_vm12, %v972_v61, %v177_v8 }
  0xca   :  { %v498_v63 = vadd.f32 %v490_v32, %v722_v15  ;;  %vm180_vm14 = vcmp.eq.f32.partialorder %v972_v61, 0.0  ;;  %v1222_v19 = vsub.f32 1.0, %v870_v58  ;;  %v162_v28 = vmul.f32 0.5, %v161_v33 }
  0xcb   :  { %v476_v38 = vmul.f32 %v468_v4, %v391_v60  ;;  %v182_v54 = vsel %vm180_vm14, %v181_v34, %v179_v48  ;;  %v486_v61 = vsub.f32 %v714_v10, %v712_v9  ;;  %v414_v58 = vsel %vm1097_vm15, %v929_v46, %v410_v12 }
  0xcc   :  { %v395_v6 = vmul.f32 %v853_v25, %v1222_v19  ;;  %v530_v36 = vsel %vm506_vm13, %v724_v16, %v498_v63  ;;  %v453_v16 = vsub.f32 %v840_v17, %v182_v54  ;;  %613 = vrcp.f32 %v943_v18 }
  0xcd   :  { %538 = vst [vmem:[#allocation6 + $0x8] sm:$0xff] %v530_v36  ;;  %v1225_v39 = vsub.f32 %v720_v14, %v716_v11  ;;  %v418_v57 = vor.u32 1.1754944e-38, %v417_v20  ;;  %v163_v62 = vsub.f32 1.5, %v162_v28  ;;  %vm416_vm0 = vcmp.eq.f32.partialorder %v415_v35, 8.507059e+37 }
  0xce   :  { %v462_v24 = vmul.f32 %v893_v13, %v453_v16  ;;  %v396_v60 = vadd.f32 %v853_v25, %v395_v6  ;;  %v421_v46 = vmul.f32 %v1046_v59, %v983_v55  ;;  %vm398_vm1 = vweird.f32 %v853_v25 }
  0xcf   :  { %v492_v22 = vmul.f32 %v1225_v39, %v476_v38  ;;  %v612_v47 = vpop.eup %611  ;;  %v419_v26 = vsel %vm416_vm0, %v418_v57, %v414_v58  ;;  %v164_v52 = vmul.f32 %v610_v43, %v163_v62  ;;  %vm508_vm2 = vcmp.ge.f32.partialorder %v158_v37, %v819_v56 }
  0xd0   :  { %v470_v51 = vadd.f32 %v462_v24, %v182_v54  ;;  %v184_v21 = vmul.f32 %v612_v47, %v1072_v23  ;;  %615 = vrsqrt.f32 %v1111_v40  ;;  %v403_v20 = vand.u32 2147483648, %v809_v49 }
  0xd1   :  { %v500_v3 = vadd.f32 %v492_v22, %v716_v11  ;;  %v165_v41 = vmul.f32 %v164_v52, %v1029_v7  ;;  %vm166_vm3 = vcmp.eq.f32.partialorder %v1029_v7, inf  ;;  %v169_v53 = vand.u32 2147483648, %v1029_v7 }
  0xd2   :  { %v478_v11 = vmul.f32 %v470_v51, %v419_v26  ;;  %v422_v43 = vsub.f32 1.0, %v421_v46  ;;  %v185_v2 = vmul.f32 %v612_v47, %v184_v21  ;;  %v1127_v56 = vpop.eup %613  ;;  %vm397_vm4 = vweird.f32 %v809_v49 }
  0xd3   :  { %v532_v35 = vsel %vm508_vm2, %v720_v14, %v500_v3  ;;  %v167_v37 = vsel %vm166_vm3, %v1029_v7, %v165_v41  ;;  %vm168_vm5 = vcmp.eq.f32.partialorder %v1029_v7, 0.0  ;;  %vm1134_vm6 = vmor %vm397_vm4, %vm398_vm1  ;;  %v401_v5 = vand.u32 2147483647, %v809_v49 }
  0xd4   :  { %540 = vst [vmem:[#allocation6 + $0x18] sm:$0xff] %v532_v35  ;;  %v494_v14 = vmul.f32 %v486_v61, %v478_v11  ;;  %v170_v50 = vsel %vm168_vm5, %v169_v53, %v167_v37  ;;  %v186_v12 = vmul.f32 0.5, %v185_v2  ;;  %v400_v8 = vsel %vm1134_vm6, %v853_v25, %v396_v60 }
  0xd5   :  { %v452_v34 = vsub.f32 %v798_v42, %v170_v50  ;;  %v404_v4 = vor.u32 1.1754944e-38, %v403_v20  ;;  %v423_v33 = vmul.f32 %v1046_v59, %v422_v43  ;;  %vm510_vm7 = vcmp.ge.f32.partialorder %v182_v54, %v840_v17 }
  0xd6   :  { %v616_v63 = vpop.eup %615  ;;  %v502_v7 = vadd.f32 %v494_v14, %v712_v9  ;;  %v187_v48 = vsub.f32 1.5, %v186_v12  ;;  %v435_v49 = vmul.f32 %v1127_v56, %v943_v18  ;;  %vm402_vm8 = vcmp.eq.f32.partialorder %v401_v5, 8.507059e+37 }
  0xd7   :  { %v461_v19 = vmul.f32 %v893_v13, %v452_v34  ;;  %v196_v6 = vmul.f32 %v616_v63, %v1111_v40  ;;  %v485_v9 = vsub.f32 %v696_v1, %v694_v0  ;;  %v405_v38 = vsel %vm402_vm8, %v404_v4, %v400_v8 }
  0xd8   :  { %v534_v25 = vsel %vm510_vm7, %v714_v10, %v502_v7  ;;  %v188_v36 = vmul.f32 %v612_v47, %v187_v48  ;;  %v424_v17 = vadd.f32 %v1046_v59, %v423_v33  ;;  %vm426_vm9 = vweird.f32 %v1046_v59 }
  0xd9   :  { %542 = vst [vmem:[#allocation6 + $0x28] sm:$0xff] %v534_v25  ;;  %v469_v15 = vadd.f32 %v461_v19, %v170_v50  ;;  %v197_v28 = vmul.f32 %v616_v63, %v196_v6  ;;  %vm190_vm10 = vcmp.eq.f32.partialorder %v1072_v23, inf  ;;  %v193_v10 = vand.u32 2147483648, %v1072_v23 }
  0xda   :  { %v189_v54 = vmul.f32 %v188_v36, %v1072_v23  ;;  %v436_v58 = vsub.f32 1.0, %v435_v49  ;;  %vm425_vm11 = vweird.f32 %v983_v55  ;;  %v431_v39 = vand.u32 2147483648, %v983_v55 }
  0xdb   :  { %v477_v61 = vmul.f32 %v469_v15, %v405_v38  ;;  %v198_v16 = vmul.f32 0.5, %v197_v28  ;;  %vm192_vm12 = vcmp.eq.f32.partialorder %v1072_v23, 0.0  ;;  %v429_v62 = vand.u32 2147483647, %v983_v55  ;;  %vm427_vm13 = vmor %vm425_vm11, %vm426_vm9 }
  0xdc   :  { %v191_v22 = vsel %vm190_vm10, %v1072_v23, %v189_v54  ;;  %v428_v3 = vsel %vm427_vm13, %v1046_v59, %v424_v17  ;;  %v437_v26 = vmul.f32 %v1127_v56, %v436_v58  ;;  %vm509_vm14 = vcmp.ge.f32.partialorder %v170_v50, %v798_v42 }
  0xdd   :  { %v493_v57 = vmul.f32 %v485_v9, %v477_v61  ;;  %v194_v24 = vsel %vm192_vm12, %v193_v10, %v191_v22  ;;  %v199_v60 = vsub.f32 1.5, %v198_v16  ;;  %v432_v23 = vor.u32 1.1754944e-38, %v431_v39 }
  0xde   :  { %v454_v46 = vsub.f32 %v966_v44, %v194_v24  ;;  %v487_v55 = vsub.f32 %v736_v31, %v734_v30  ;;  %vm430_vm15 = vcmp.eq.f32.partialorder %v429_v62, 8.507059e+37  ;;  %vm202_vm0 = vcmp.eq.f32.partialorder %v1111_v40, inf }
  0xdf   :  { %v501_v47 = vadd.f32 %v493_v57, %v694_v0  ;;  %v200_v52 = vmul.f32 %v616_v63, %v199_v60  ;;  %v433_v0 = vsel %vm430_vm15, %v432_v23, %v428_v3  ;;  %v205_v59 = vand.u32 2147483648, %v1111_v40 }
  0xe0   :  { %v463_v51 = vmul.f32 %v893_v13, %v454_v46  ;;  %v438_v42 = vadd.f32 %v1127_v56, %v437_v26  ;;  %vm440_vm1 = vweird.f32 %v1127_v56  ;;  %vm204_vm2 = vcmp.eq.f32.partialorder %v1111_v40, 0.0 }
  0xe1   :  { %v533_v21 = vsel %vm509_vm14, %v696_v1, %v501_v47  ;;  %v201_v35 = vmul.f32 %v200_v52, %v1111_v40  ;;  %v445_v1 = vand.u32 2147483648, %v943_v18  ;;  %vm439_vm3 = vweird.f32 %v943_v18 }
  0xe2   :  { %541 = vst [vmem:[#allocation6 + $0x20] sm:$0xff] %v533_v21  ;;  %v471_v20 = vadd.f32 %v463_v51, %v194_v24  ;;  %v443_v43 = vand.u32 2147483647, %v943_v18  ;;  %vm441_vm4 = vmor %vm439_vm3, %vm440_vm1  ;;  %vm511_vm5 = vcmp.ge.f32.partialorder %v194_v24, %v966_v44 }
  0xe3   :  { %v203_v41 = vsel %vm202_vm0, %v1111_v40, %v201_v35  ;;  %v442_v14 = vsel %vm441_vm4, %v1127_v56, %v438_v42  ;;  %v446_v50 = vor.u32 1.1754944e-38, %v445_v1  ;;  %v488_v40 = vsub.f32 %v732_v29, %v730_v27 }
  0xe4   :  { %v479_v11 = vmul.f32 %v471_v20, %v433_v0  ;;  %v206_v53 = vsel %vm204_vm2, %v205_v59, %v203_v41  ;;  %vm444_vm6 = vcmp.eq.f32.partialorder %v443_v43, 8.507059e+37 }
  0xe5   :  { %v455_v2 = vsub.f32 %v912_v45, %v206_v53  ;;  %v447_v8 = vsel %vm444_vm6, %v446_v50, %v442_v14  ;;  %vm512_vm7 = vcmp.ge.f32.partialorder %v206_v53, %v912_v45 }
  0xe6   :  { %v495_v37 = vmul.f32 %v487_v55, %v479_v11 }
  0xe7   :  { %v464_v32 = vmul.f32 %v893_v13, %v455_v2 }
  0xe8   :  { %v503_v5 = vadd.f32 %v495_v37, %v734_v30 }
  0xe9   :  { %v472_v12 = vadd.f32 %v464_v32, %v206_v53 }
  0xea   :  { %v535_v18 = vsel %vm511_vm5, %v736_v31, %v503_v5 }
  0xeb   :  { %543 = vst [vmem:[#allocation6 + $0x30] sm:$0xff] %v535_v18  ;;  %v480_v56 = vmul.f32 %v472_v12, %v447_v8 }
  0xed   :  { %v496_v13 = vmul.f32 %v488_v40, %v480_v56 }
  0xef   :  { %v504_v30 = vadd.f32 %v496_v13, %v730_v27 }
  0xf1   :  { %v536_v44 = vsel %vm512_vm7, %v732_v29, %v504_v30 }
  0xf2   :  { %544 = vst [vmem:[#allocation6 + $0x38] sm:$0xff] %v536_v44 }
  0xf3   :  { %558 = dma.vmem_to_hbm [thread:$0]  %s551_s20, 1024, %s553_s21, [#allocation5], %s670_s14, %s670_s14, %s671_s15  }
  0xf4   :  { %667 = dma.done.wait [#allocation5], 1024  }
  0xf5   :  { %668 = vsyncadd [#allocation5], 4294966272 }
  0xf6   :  { %563 = vsyncpa [#allocation4], 1 }
  0xf7   :  { %564 = vsyncpa [#allocation5], 1 }

</bundles_post_ra>
